<compile_context>
chip_gen: v7x
topology: tpu7x:2x2x1
jax: 0.10.0
libtpu: 0.0.40
codegen_flags: <defaults>
</compile_context>

<pallas_src>
import functools

import jax
import jax.numpy as jnp
from jax.experimental import pallas as pl
from jax.experimental.pallas import tpu as pltpu


def _round_up(x, m):
    return ((x + m - 1) // m) * m


def _pick_tile(dim128, target):
    """Largest multiple of 128 that divides dim128 and is <= target (>= 128)."""
    best = 128
    t = 128
    while t <= min(target, dim128):
        if dim128 % t == 0:
            best = t
        t += 128
    return best


def _vmem_limit_bytes():
    """~3/4 of physical VMEM, capped at 100 MiB.
    v5e/v6e (128 MiB) -> 96 MiB; v7x (64 MiB) -> 48 MiB; fallback 48 MiB."""
    try:
        cap = int(pltpu.get_tpu_info().vmem_capacity_bytes)
    except Exception:
        cap = 64 * 1024 * 1024
    return min((cap // 4) * 3, 100 * 1024 * 1024)


def plan_pipeline_stage(batch, in_features, out_features, *,
                        compute_dtype=jnp.bfloat16,
                        tn_target=2048, tk_target=2048):
    """Static tile plan (shapes / tiles / path selection), computed once."""
    c_size = jnp.dtype(compute_dtype).itemsize
    sublane = 8 * (4 // c_size)                    # bf16 -> 16, f32 -> 8
    m_pad = _round_up(max(batch, 1), sublane)
    k_pad = _round_up(in_features, 128)
    n_pad = _round_up(out_features, 128)
    vmem_limit = _vmem_limit_bytes()
    budget = int(vmem_limit * 0.7)                 # leave headroom for Mosaic

    tn = _pick_tile(n_pad, tn_target)
    # v7x megacore: prefer >= 2 blocks on the parallel N axis when possible.
    if n_pad // tn < 2 and n_pad >= 256:
        tn = _pick_tile(n_pad, n_pad // 2)

    def fullk_bytes(tn_):
        return (2 * k_pad * tn_ * c_size           # weight slab, double-buffered
                + 2 * m_pad * k_pad * c_size       # resident x (conservative x2)
                + 2 * m_pad * tn_ * 4)             # output tile (f32), x2

    full_k, tn_sel = False, tn
    candidates = [t for t in range(128, min(tn, n_pad) + 1, 128) if n_pad % t == 0]
    for tn_try in sorted(candidates, reverse=True):
        if fullk_bytes(tn_try) <= budget:
            full_k, tn_sel = True, tn_try
            break
    tn = tn_sel
    tk = k_pad if full_k else _pick_tile(k_pad, tk_target)

    return dict(batch=batch, in_features=in_features, out_features=out_features,
                m_pad=m_pad, k_pad=k_pad, n_pad=n_pad, tn=tn, tk=tk,
                full_k=full_k, vmem_limit=vmem_limit, compute_dtype=compute_dtype)


def prepare_pipeline_stage_weights(split_weights, plan):
    """One-time weight layout: fuse splits, transpose to [K, N], pad, cast.

    split_weights: [split_size, out_features // split_size, in_features]
    Returns the cached bf16 slab of shape [k_pad, n_pad] to reuse every forward.
    """
    split_size, out_per_split, in_f = split_weights.shape
    out_features = split_size * out_per_split
    assert in_f == plan["in_features"] and out_features == plan["out_features"]
    w_all_t = split_weights.reshape(out_features, in_f).T        # [K, N]
    w_p = jnp.pad(w_all_t, ((0, plan["k_pad"] - in_f),
                            (0, plan["n_pad"] - out_features))
                  ).astype(plan["compute_dtype"])
    return jax.block_until_ready(w_p)


def _mp_linear_fullk_kernel(x_ref, w_ref, o_ref):
    """Single grid axis over N: one MXU dot per tile, no accumulator."""
    o_ref[...] = jnp.dot(x_ref[...], w_ref[...],
                         preferred_element_type=jnp.float32).astype(o_ref.dtype)


def _mp_linear_ktiled_kernel(x_ref, w_ref, o_ref, *, tk):
    """Fallback (huge K): grid (N, K). x fully resident, sliced in-kernel;
    accumulate directly into the f32 o_ref (block index ignores k)."""
    k = pl.program_id(1)
    start = pl.multiple_of(k * tk, tk)
    partial = jnp.dot(x_ref[:, pl.ds(start, tk)], w_ref[...],
                      preferred_element_type=jnp.float32)

    @pl.when(k == 0)
    def _():
        o_ref[...] = partial

    @pl.when(k > 0)
    def _():
        o_ref[...] += partial


def pipeline_stage_forward(x, w_prepared, plan):
    """x: [B, in_features]; w_prepared: cached [k_pad, n_pad] slab from
    prepare_pipeline_stage_weights.  Returns [B, out_features] in x.dtype."""
    B, in_f = x.shape
    assert in_f == plan["in_features"]
    m_pad, k_pad, n_pad = plan["m_pad"], plan["k_pad"], plan["n_pad"]
    tn, tk = plan["tn"], plan["tk"]
    cdt = plan["compute_dtype"]
    c_size = jnp.dtype(cdt).itemsize
    out_features = plan["out_features"]

    x_p = jnp.pad(x, ((0, m_pad - B), (0, k_pad - in_f))).astype(cdt)

    cost = pl.CostEstimate(
        flops=2 * m_pad * k_pad * n_pad,
        transcendentals=0,
        bytes_accessed=(k_pad * n_pad * c_size          # weights (dominant)
                        + m_pad * k_pad * c_size        # x
                        + m_pad * n_pad * 4),           # y
    )

    if plan["full_k"]:
        y_pad = pl.pallas_call(
            _mp_linear_fullk_kernel,
            out_shape=jax.ShapeDtypeStruct((m_pad, n_pad), x.dtype),
            grid_spec=pltpu.PrefetchScalarGridSpec(
                num_scalar_prefetch=0,
                grid=(n_pad // tn,),
                in_specs=[
                    # x: tiny, fully resident (constant block index => one DMA).
                    pl.BlockSpec((m_pad, k_pad), lambda n: (0, 0)),
                    # weights: streamed full-K slabs, double-buffered by Pallas.
                    pl.BlockSpec((k_pad, tn), lambda n: (0, n)),
                ],
                out_specs=pl.BlockSpec((m_pad, tn), lambda n: (0, n)),
            ),
            compiler_params=pltpu.CompilerParams(
                dimension_semantics=("parallel",),
                vmem_limit_bytes=plan["vmem_limit"],
            ),
            cost_estimate=cost,
        )(x_p, w_prepared)
    else:
        y_pad = pl.pallas_call(
            functools.partial(_mp_linear_ktiled_kernel, tk=tk),
            out_shape=jax.ShapeDtypeStruct((m_pad, n_pad), jnp.float32),
            grid_spec=pltpu.PrefetchScalarGridSpec(
                num_scalar_prefetch=0,
                grid=(n_pad // tn, k_pad // tk),   # K innermost ("arbitrary")
                in_specs=[
                    pl.BlockSpec((m_pad, k_pad), lambda n, k: (0, 0)),
                    pl.BlockSpec((tk, tn), lambda n, k: (k, n)),
                ],
                out_specs=pl.BlockSpec((m_pad, tn), lambda n, k: (0, n)),
            ),
            compiler_params=pltpu.CompilerParams(
                dimension_semantics=("parallel", "arbitrary"),
                vmem_limit_bytes=plan["vmem_limit"],
            ),
            cost_estimate=cost,
        )(x_p, w_prepared)

    return y_pad[:B, :out_features].astype(x.dtype)


def init_split_weights(key, in_features, out_features, split_size):
    """Deterministic init mimicking nn.Linear's default kaiming-uniform:
    U(-1/sqrt(in_features), 1/sqrt(in_features)) per split layer."""
    assert out_features % split_size == 0
    out_per_split = out_features // split_size
    bound = 1.0 / (in_features ** 0.5)
    keys = jax.random.split(key, split_size)
    ws = [
        jax.random.uniform(k, (out_per_split, in_features),
                           minval=-bound, maxval=bound, dtype=jnp.float32)
        for k in keys
    ]
    return jnp.stack(ws, axis=0)  # [split_size, out_per_split, in_features]


if __name__ == "__main__":
    # Small shapes consistent with the module: batch=8, in=32, out=64, split=2.
    B, in_features, out_features, split_size = 8, 32, 64, 2

    key = jax.random.PRNGKey(0)
    kx, kw = jax.random.split(key)
    x = jax.random.normal(kx, (B, in_features), dtype=jnp.float32)
    split_weights = init_split_weights(kw, in_features, out_features, split_size)

    # One-time setup (plan + cached weight layout), then the per-call forward.
    plan = plan_pipeline_stage(B, in_features, out_features)
    w_prepared = prepare_pipeline_stage_weights(split_weights, plan)

    y = jax.block_until_ready(pipeline_stage_forward(x, w_prepared, plan))

    # Reference 1: exact PyTorch semantics in f32 (per-split matmul + concat).
    y_ref_f32 = jnp.concatenate(
        [x @ split_weights[s].T for s in range(split_size)], axis=1)
    # Reference 2: same bf16-input / f32-accumulate numerics as the kernel.
    w_all_t = split_weights.reshape(out_features, in_features).T
    y_ref_bf16 = jnp.dot(x.astype(jnp.bfloat16), w_all_t.astype(jnp.bfloat16),
                         preferred_element_type=jnp.float32)

    assert y.shape == (B, out_features)
    assert jnp.allclose(y, y_ref_bf16, atol=1e-3, rtol=1e-3)
    assert jnp.allclose(y, y_ref_f32, atol=3e-2, rtol=3e-2)

    print("KERNEL_OK")
</pallas_src>

<mosaic_0001>
module attributes {stable_mosaic.version = 11 : i64} {
  func.func @_mp_linear_fullk_kernel(%arg0: i32, %arg1: memref<16x128xbf16, #tpu.memory_space<vmem>>, %arg2: memref<128x128xbf16, #tpu.memory_space<vmem>>, %arg3: memref<16x128xf32, #tpu.memory_space<vmem>>) attributes {dimension_semantics = [#tpu.dimension_semantics<parallel>], iteration_bounds = array<i64: 1>, scalar_prefetch = 0 : i64, scratch_operands = 0 : i64, tpu.core_type = #tpu.core_type<tc>, window_params = [{pipeline_mode = #tpu.pipeline_mode<synchronous>, transform_indices = @transform_0, window_bounds = array<i64: 16, 128>}, {transform_indices = @transform_1, window_bounds = array<i64: 128, 128>}, {transform_indices = @transform_2, window_bounds = array<i64: 16, 128>}]} {
    %c0 = arith.constant 0 : index
    %c0_0 = arith.constant 0 : index
    %0 = vector.load %arg1[%c0, %c0_0] : memref<16x128xbf16, #tpu.memory_space<vmem>>, vector<16x128xbf16>
    %c0_1 = arith.constant 0 : index
    %c0_2 = arith.constant 0 : index
    %1 = vector.load %arg2[%c0_1, %c0_2] : memref<128x128xbf16, #tpu.memory_space<vmem>>, vector<128x128xbf16>
    %cst = arith.constant dense<0.000000e+00> : vector<16x128xf32>
    %2 = tpu.matmul %0, %1, %cst {dimension_numbers = #tpu.dot_dimension_numbers<[1], [0], [0], [1], [0, 0, 1, 1], [], []>} : vector<16x128xbf16>, vector<128x128xbf16>, vector<16x128xf32> -> vector<16x128xf32>
    %c0_3 = arith.constant 0 : index
    %c0_4 = arith.constant 0 : index
    %3 = vector.load %arg3[%c0_3, %c0_4] : memref<16x128xf32, #tpu.memory_space<vmem>>, vector<16x128xf32>
    tpu.vector_store %arg3[%c0_3, %c0_4], %2 {strides = array<i32>} : memref<16x128xf32, #tpu.memory_space<vmem>>, vector<16x128xf32>,
    return
  }
  func.func @transform_0(%arg0: i32) -> (i32, i32) {
    %c0_i32 = arith.constant 0 : i32
    %c0_i32_0 = arith.constant 0 : i32
    %c0_i32_1 = arith.constant 0 : i32
    return %c0_i32, %c0_i32_0 : i32, i32
  }
  func.func @transform_1(%arg0: i32) -> (i32, i32) {
    %c0_i32 = arith.constant 0 : i32
    %c0_i32_0 = arith.constant 0 : i32
    return %c0_i32, %arg0 : i32, i32
  }
  func.func @transform_2(%arg0: i32) -> (i32, i32) {
    %c0_i32 = arith.constant 0 : i32
    %c0_i32_0 = arith.constant 0 : i32
    return %c0_i32, %arg0 : i32, i32
  }
}

</mosaic_0001>

<bundles_post_ra>
// kernel: tpu_custom_call.1
= control target key start
LH: loop header
LB: loop body
LE: loop exit
PB: predicated region body
PF: predicated region fallthrough
CT: control target
= control target key end

     0   :  { %7 = vsyncpa [#allocation3], 0  ;;  %s362_s0 = inlined_call_operand.hbm [shape: bf16[16,128], index: 0, kind: input, shape index: {}]   ;;  %s363_s1 = inlined_call_operand.hbm [shape: bf16[128,128], index: 1, kind: input, shape index: {}]   ;;  %s364_s2 = inlined_call_operand.hbm [shape: f32[16,128], index: 2, kind: output, shape index: {}]  }
   0x1   :  { %8 = vsyncpa [#allocation6], 0 }
   0x2   :  { %9 = vsyncpa [#allocation4], 0  ;;  %s302_s9 = smov [#allocation2]   ;;  %s230_s13 = scalar_lea.hbm %s362_s0, 128 }
   0x3   :  { %s15_s10 = sshll.u32 %s302_s9, 4  ;;  %p231_p0 = scmp.ne.s32.totalorder %s362_s0, %s230_s13  ;;  %s16_s10 = int_to_ptr.vmem [resolvable:$true] %s15_s10 }
   0x4   :  { %p234_p1 = scmp.lt.u32.totalorder %s230_s13, %s362_s0 }
   0x6   :  { %p236_p2 = pnand %p234_p1, %p231_p0 }
   0x8   :  { %239 = shalt.err (!%p236_p2)
}
   0x9   :  { %s240_s18 = scalar_lea.vmem %s16_s10, 128  ;;  %p245_p4 = scmp.lt.s32.totalorder %s16_s10, %s16_s10 }
   0xa   :  { %p241_p3 = scmp.ne.s32.totalorder %s16_s10, %s240_s18  ;;  %p246_p5 = scmp.lt.s32.totalorder %s240_s18, %s240_s18 }
   0xc   :  { %p247_p6 = por %p246_p5, %p245_p4 }
   0xe   :  { %p248_p7 = pnand %p247_p6, %p241_p3 }
  0x10   :  { %251 = shalt.err (!%p248_p7)
}
  0x11   :  { %s303_s19 = smov 64   ;;  %s304_s20 = smov 4  }
  0x12   :  { %21 = dma.hbm_to_vmem [thread:$0]  %s362_s0, 128, %s16_s10, [#allocation3], %s303_s19, %s303_s19, %s304_s20  }
  0x13   :  { %s305_s23 = smov [#allocation5]   ;;  %s252_s27 = scalar_lea.hbm %s363_s1, 1024 }
  0x14   :  { %s27_s24 = sshll.u32 %s305_s23, 4  ;;  %p253_p8 = scmp.ne.s32.totalorder %s363_s1, %s252_s27  ;;  %s28_s24 = int_to_ptr.vmem [resolvable:$true] %s27_s24 }
  0x15   :  { %p256_p9 = scmp.lt.u32.totalorder %s252_s27, %s363_s1 }
  0x17   :  { %p258_p10 = pnand %p256_p9, %p253_p8 }
  0x19   :  { %261 = shalt.err (!%p258_p10)
}
  0x1a   :  { %s262_s4 = scalar_lea.vmem %s28_s24, 1024  ;;  %p267_p12 = scmp.lt.s32.totalorder %s28_s24, %s28_s24 }
  0x1b   :  { %p263_p11 = scmp.ne.s32.totalorder %s28_s24, %s262_s4  ;;  %p268_p13 = scmp.lt.s32.totalorder %s262_s4, %s262_s4 }
  0x1d   :  { %p269_p0 = por %p268_p13, %p267_p12 }
  0x1f   :  { %p270_p1 = pnand %p269_p0, %p263_p11 }
  0x21   :  { %273 = shalt.err (!%p270_p1)
}
  0x22   :  { %33 = dma.hbm_to_vmem [thread:$0]  %s363_s1, 1024, %s28_s24, [#allocation6], %s303_s19, %s303_s19, %s304_s20  }
  0x23   :  { %296 = dma.done.wait [#allocation3], 128  }
  0x24   :  { %297 = vsyncadd [#allocation3], 4294967168 }
  0x25   :  { %298 = dma.done.wait [#allocation6], 1024  }
  0x26   :  { %299 = vsyncadd [#allocation6], 4294966272  ;;  %v306_v0 = vmov 0.0   ;;  %vm307_vm0 = vmmov 0   ;;  %v221_v1 = vld [vmem:[#allocation5] sm:$0xff]   ;;  %v222_v2 = vld [vmem:[#allocation5 + $0x8] sm:$0xff]  }
  0x27   :  { %192 = vmatprep.subr.bf16.mxu0 %v306_v0  ;;  %208 = vmatprep.mubr.msk.bf16.mxu0 %vm307_vm0, %v306_v0  ;;  %v223_v3 = vld [vmem:[#allocation5 + $0x10] sm:$0xff]   ;;  %v224_v4 = vld [vmem:[#allocation5 + $0x18] sm:$0xff]   ;;  %v225_v5 = vld [vmem:[#allocation5 + $0x20] sm:$0xff]   ;;  %s308_s1 = smov [#allocation7]  }
  0x28   :  { %193 = vmatpush3.bf16.msra.mxu0 %v221_v1  ;;  %v226_v6 = vld [vmem:[#allocation5 + $0x28] sm:$0xff]   ;;  %v227_v7 = vld [vmem:[#allocation5 + $0x30] sm:$0xff]   ;;  %v228_v8 = vld [vmem:[#allocation5 + $0x38] sm:$0xff]   ;;  %s161_s6 = sshll.u32 %s308_s1, 4  ;;  %s162_s6 = int_to_ptr.vmem [resolvable:$true] %s161_s6 }
  0x29   :  { %194 = vmatprep.subr.bf16.mxu0 %v306_v0  ;;  %v229_v9 = vld [vmem:[#allocation2] sm:$0xff]   ;;  %s274_s7 = scalar_lea.vmem %s162_s6, 256  ;;  %p279_p3 = scmp.lt.s32.totalorder %s162_s6, %s162_s6 }
  0x2a   :  { %p275_p2 = scmp.ne.s32.totalorder %s162_s6, %s274_s7  ;;  %p280_p4 = scmp.lt.s32.totalorder %s274_s7, %s274_s7 }
  0x2c   :  { %195 = vmatpush3.bf16.msra.mxu0 %v222_v2  ;;  %p281_p5 = por %p280_p4, %p279_p3 }
  0x2d   :  { %196 = vmatprep.subr.bf16.mxu0 %v306_v0 }
  0x2e   :  { %p282_p6 = pnand %p281_p5, %p275_p2 }
  0x30   :  { %197 = vmatpush3.bf16.msra.mxu0 %v223_v3 }
  0x31   :  { %198 = vmatprep.subr.bf16.mxu0 %v306_v0 }
  0x34   :  { %199 = vmatpush3.bf16.msra.mxu0 %v224_v4 }
  0x35   :  { %200 = vmatprep.subr.bf16.mxu0 %v306_v0 }
  0x38   :  { %201 = vmatpush3.bf16.msra.mxu0 %v225_v5 }
  0x39   :  { %202 = vmatprep.subr.bf16.mxu0 %v306_v0 }
  0x3c   :  { %203 = vmatpush3.bf16.msra.mxu0 %v226_v6 }
  0x3d   :  { %204 = vmatprep.subr.bf16.mxu0 %v306_v0 }
  0x40   :  { %205 = vmatpush3.bf16.msra.mxu0 %v227_v7 }
  0x41   :  { %206 = vmatprep.subr.bf16.mxu0 %v306_v0 }
  0x44   :  { %207 = vmatpush3.bf16.msra.mxu0 %v228_v8 }
  0x47   :  { %209 = vmatmul.mubr.bf16.vlgmr.msra.gmra.mrb[0].mxu0 %v229_v9 }
 0x11a   :  { %v147_v10 = vpop.f32.mrb[0].mxu0 }
 0x11b   :  { %154 = vst [vmem:[#allocation7] sm:$0xff] %v147_v10  ;;  %v210_v11 = vpop.f32.mrb[1].mxu0 }
 0x11c   :  { %v150_v12 = vpop.f32.mrb[2].mxu0 }
 0x11d   :  { %155 = vst [vmem:[#allocation7 + $0x8] sm:$0xff] %v150_v12  ;;  %v211_v13 = vpop.f32.mrb[3].mxu0 }
 0x11e   :  { %285 = shalt.err (!%p282_p6)
}
 0x11f   :  { %s286_s10 = scalar_lea.hbm %s364_s2, 256 }
 0x120   :  { %p287_p7 = scmp.ne.s32.totalorder %s364_s2, %s286_s10  ;;  %p290_p8 = scmp.lt.u32.totalorder %s286_s10, %s364_s2 }
 0x122   :  { %p292_p9 = pnand %p290_p8, %p287_p7 }
 0x124   :  { %295 = shalt.err (!%p292_p9)
}
 0x125   :  { %s309_s15 = smov 128   ;;  %s310_s16 = smov 8  }
 0x126   :  { %167 = dma.vmem_to_hbm [thread:$0]  %s162_s6, 256, %s364_s2, [#allocation4], %s309_s15, %s309_s15, %s310_s16  }
 0x127   :  { %300 = dma.done.wait [#allocation4], 256  }
 0x128   :  { %301 = vsyncadd [#allocation4], 4294967040 }
 0x129   :  { %171 = vsyncpa [#allocation3], 1 }
 0x12a   :  { %172 = vsyncpa [#allocation6], 1 }
 0x12b   :  { %173 = vsyncpa [#allocation4], 1 }

</bundles_post_ra>
